<compile_context>
chip_gen: v7x
topology: tpu7x:2x2x1
jax: 0.10.0
libtpu: 0.0.40
codegen_flags: <defaults>
</compile_context>

<pallas_src>
import functools
import math

import jax
import jax.numpy as jnp
from jax import lax
from jax.experimental import pallas as pl
from jax.experimental.pallas import tpu as pltpu

_VMEM_LIMIT = 48 * 1024 * 1024  # headroom below v7x's 64 MiB physical VMEM


def _pick_tile(dim, target, align):
    """Largest tile <= target that divides dim and is a multiple of align."""
    if dim <= target:
        return dim
    t = (target // align) * align
    while t >= align:
        if dim % t == 0:
            return t
        t -= align
    # TODO(synk): awkward (non power-of-two) dims fall back to the full
    # dimension; pad/mask edge tiles instead if this ever busts VMEM.
    return dim


# ----------------------------- tiled linear ---------------------------------

def _linear_kernel(x_ref, w_ref, b_ref, o_ref):
    # Whole contraction (K) resident: one MXU matmul per output tile, no
    # accumulator scratch or pl.when phases. x is cast to the MXU dtype
    # in-kernel (saves a full HBM read+write of x vs a standalone astype).
    x = x_ref[...].astype(w_ref.dtype)
    acc = jnp.dot(x, w_ref[...], preferred_element_type=jnp.float32)
    o_ref[...] = (acc + b_ref[...]).astype(o_ref.dtype)


def pallas_linear(x2d, w, b, out_dtype, tm=512, tn=1024):
    """x2d: [M, K] (any float dtype), w: [K, N], b: [N] f32 -> [M, N] = x @ w + b."""
    M, K = x2d.shape
    K2, N = w.shape
    assert K == K2
    # TODO(synk): re-introduce a K grid axis for very large K (>~4k) where the
    # K-resident tiles would exceed the scoped VMEM limit.
    tm = _pick_tile(M, tm, 16)    # 16-row alignment for bf16 sublane packing
    tn = _pick_tile(N, tn, 128)
    grid = (M // tm, N // tn)
    return pl.pallas_call(
        _linear_kernel,
        out_shape=jax.ShapeDtypeStruct((M, N), out_dtype),
        grid_spec=pltpu.PrefetchScalarGridSpec(
            num_scalar_prefetch=0,
            grid=grid,
            in_specs=[
                pl.BlockSpec((tm, K), lambda i, j: (i, 0)),
                pl.BlockSpec((K, tn), lambda i, j: (0, j)),
                pl.BlockSpec((1, tn), lambda i, j: (0, j)),
            ],
            out_specs=pl.BlockSpec((tm, tn), lambda i, j: (i, j)),
        ),
        compiler_params=pltpu.CompilerParams(
            dimension_semantics=("parallel", "parallel"),
            vmem_limit_bytes=_VMEM_LIMIT),
    )(x2d, w, b.reshape(1, N))


# ------------------------------ attention ------------------------------------

def _attention_kernel(*refs, has_mask):
    """One (batch, head, query-tile) grid step: exact row-wise softmax."""
    if has_mask:
        q_ref, k_ref, v_ref, mask_ref, vals_ref, attn_ref = refs
    else:
        q_ref, k_ref, v_ref, vals_ref, attn_ref = refs

    # q already carries the 1/sqrt(head_dim) scale (folded into the weights).
    scores = lax.dot_general(q_ref[...], k_ref[...],
                             (((1,), (1,)), ((), ())),
                             preferred_element_type=jnp.float32)   # [tq, S] f32
    if has_mask:
        scores = scores + mask_ref[...]

    m = jnp.max(scores, axis=-1, keepdims=True)
    e = jnp.exp(scores - m)
    denom = jnp.sum(e, axis=-1, keepdims=True)
    probs = e / denom                       # exact divide: f32 softmax parity

    attn_ref[...] = probs
    vals = jnp.dot(probs.astype(v_ref.dtype), v_ref[...],
                   preferred_element_type=jnp.float32)             # [tq, hd]
    vals_ref[...] = vals.astype(vals_ref.dtype)


def pallas_attention(qkvT, mask, compute_dtype, tq_target=256):
    """qkvT: [3, B, H, S, hd]; mask: [S, S] f32 or None.

    Grid = (B, H, query-tiles), all parallel; batches/heads/components are
    selected by the BlockSpec index maps so the DMA engine does the gather and
    per-step VMEM is O(tq*S) per head rather than O(H*S^2).
    """
    _, B, H, S, hd = qkvT.shape
    tq = _pick_tile(S, tq_target, 16)
    nq = S // tq
    has_mask = mask is not None

    in_specs = [
        pl.BlockSpec((None, None, None, tq, hd), lambda b, h, qi: (0, b, h, qi, 0)),
        pl.BlockSpec((None, None, None, S, hd), lambda b, h, qi: (1, b, h, 0, 0)),
        pl.BlockSpec((None, None, None, S, hd), lambda b, h, qi: (2, b, h, 0, 0)),
    ]
    args = [qkvT, qkvT, qkvT]
    if has_mask:
        # Mask is tiled along the query axis: only (tq, S) resident per step.
        in_specs.append(pl.BlockSpec((tq, S), lambda b, h, qi: (qi, 0)))
        args.append(mask)

    kernel = functools.partial(_attention_kernel, has_mask=has_mask)
    return pl.pallas_call(
        kernel,
        out_shape=(
            jax.ShapeDtypeStruct((B, H, S, hd), compute_dtype),
            jax.ShapeDtypeStruct((B, H, S, S), jnp.float32),
        ),
        grid_spec=pltpu.PrefetchScalarGridSpec(
            num_scalar_prefetch=0,
            grid=(B, H, nq),
            in_specs=in_specs,
            out_specs=(
                pl.BlockSpec((None, None, tq, hd), lambda b, h, qi: (b, h, qi, 0)),
                pl.BlockSpec((None, None, tq, S), lambda b, h, qi: (b, h, qi, 0)),
            ),
        ),
        compiler_params=pltpu.CompilerParams(
            dimension_semantics=("parallel", "parallel", "parallel"),
            vmem_limit_bytes=_VMEM_LIMIT),
    )(*args)


# ------------------------------- module glue ---------------------------------

class MultiheadAttentionPallas:
    def __init__(self, d_model, num_heads, key, compute_dtype=jnp.bfloat16):
        assert d_model % num_heads == 0
        self.d_model = d_model
        self.num_heads = num_heads
        self.head_dim = d_model // num_heads
        self.compute_dtype = compute_dtype

        k1, k2, k3, k4 = jax.random.split(key, 4)
        bound = 1.0 / math.sqrt(d_model)   # nn.Linear-style U(-1/sqrt(fan_in), ...)
        w_qkv = jax.random.uniform(k1, (3 * d_model, d_model), jnp.float32, -bound, bound)
        b_qkv = jax.random.uniform(k2, (3 * d_model,), jnp.float32, -bound, bound)
        w_out = jax.random.uniform(k3, (d_model, d_model), jnp.float32, -bound, bound)
        b_out = jax.random.uniform(k4, (d_model,), jnp.float32, -bound, bound)

        H, hd = num_heads, self.head_dim
        # PyTorch groups the 3*d_model QKV output features as (head, component, dim);
        # reorder once to (component, head, dim) so the projection output reshapes
        # for free to [B, S, 3, H, hd]. Fold the 1/sqrt(hd) softmax scale into the
        # q rows (weights + bias) in f32, and pre-transpose (x @ W.T -> x @ M).
        scale = 1.0 / math.sqrt(hd)
        w4 = w_qkv.reshape(H, 3, hd, d_model)
        b3 = b_qkv.reshape(H, 3, hd)
        w4 = w4.at[:, 0].multiply(scale)
        b3 = b3.at[:, 0].multiply(scale)
        w_perm = w4.transpose(1, 0, 2, 3).reshape(3 * d_model, d_model)
        b_perm = b3.transpose(1, 0, 2).reshape(3 * d_model)
        self.w_qkv_t = w_perm.T.astype(compute_dtype)    # [D, 3D] bf16 (MXU input)
        self.b_qkv = b_perm                               # [3D]    f32
        self.w_out_t = w_out.T.astype(compute_dtype)      # [D, D]  bf16
        self.b_out = b_out                                 # [D]     f32

    def __call__(self, x, mask=None):
        B, S, D = x.shape
        H, hd = self.num_heads, self.head_dim
        cd = self.compute_dtype

        # QKV projection: K-resident tiled matmul; x stays f32 in HBM and is
        # cast to bf16 inside the kernel.
        x2d = x.reshape(B * S, D)
        qkv = pallas_linear(x2d, self.w_qkv_t, self.b_qkv, out_dtype=cd)   # [B*S, 3D]

        # One XLA transpose puts component/batch/head on leading axes so the
        # attention kernel can slice aligned per-(b, h) blocks with its DMA.
        qkvT = jnp.transpose(qkv.reshape(B, S, 3, H, hd), (2, 0, 3, 1, 4))  # [3,B,H,S,hd]

        mask_sq = None
        if mask is not None:
            # TODO(synk): only additive masks broadcastable to [S, S] are plumbed;
            # per-batch / per-head masks need an extra batch-indexed BlockSpec.
            mask_sq = jnp.broadcast_to(jnp.asarray(mask, jnp.float32), (S, S))

        values, attention = pallas_attention(qkvT, mask_sq, cd)
        # values: [B, H, S, hd] (compute dtype), attention: [B, H, S, S] f32

        # Reproduce the reference quirk exactly: raw row-major reshape of
        # [B, H, S, hd] -> [B, S, H*hd] (no head un-transpose) before the output
        # linear.
        # TODO(synk): fusing the output projection into the attention kernel would
        # skip this HBM round-trip but must reproduce the head-mixing reshape.
        vals2d = values.reshape(B * S, H * hd)
        out = pallas_linear(vals2d, self.w_out_t, self.b_out, out_dtype=jnp.float32)
        return out.reshape(B, S, D), attention


# ----------------------------------- main -------------------------------------

if __name__ == "__main__":
    key = jax.random.PRNGKey(0)
    k_x, k_params = jax.random.split(key)

    batch, seq, d_model, num_heads = 2, 8, 32, 4
    x = jax.random.normal(k_x, (batch, seq, d_model), dtype=jnp.float32)

    mha = MultiheadAttentionPallas(d_model, num_heads, k_params)
    out, attention = mha(x)
    jax.block_until_ready(out)
    jax.block_until_ready(attention)

    assert out.shape == (batch, seq, d_model)
    assert out.dtype == jnp.float32
    assert attention.shape == (batch, num_heads, seq, seq)
    print("KERNEL_OK")
</pallas_src>

<mosaic_0001>
module attributes {stable_mosaic.version = 11 : i64} {
  func.func @_linear_kernel(%arg0: i32, %arg1: i32, %arg2: memref<16x32xf32, #tpu.memory_space<vmem>>, %arg3: memref<32x96xbf16, #tpu.memory_space<vmem>>, %arg4: memref<1x96xf32, #tpu.memory_space<vmem>>, %arg5: memref<16x96xbf16, #tpu.memory_space<vmem>>) attributes {dimension_semantics = [#tpu.dimension_semantics<parallel>, #tpu.dimension_semantics<parallel>], iteration_bounds = array<i64: 1, 1>, scalar_prefetch = 0 : i64, scratch_operands = 0 : i64, tpu.core_type = #tpu.core_type<tc>, window_params = [{transform_indices = @transform_0, window_bounds = array<i64: 16, 32>}, {transform_indices = @transform_1, window_bounds = array<i64: 32, 96>}, {transform_indices = @transform_2, window_bounds = array<i64: 1, 96>}, {transform_indices = @transform_3, window_bounds = array<i64: 16, 96>}]} {
    %c0 = arith.constant 0 : index
    %c0_0 = arith.constant 0 : index
    %0 = vector.load %arg2[%c0, %c0_0] : memref<16x32xf32, #tpu.memory_space<vmem>>, vector<16x32xf32>
    %1 = arith.truncf %0 : vector<16x32xf32> to vector<16x32xbf16>
    %c0_1 = arith.constant 0 : index
    %c0_2 = arith.constant 0 : index
    %2 = vector.load %arg3[%c0_1, %c0_2] : memref<32x96xbf16, #tpu.memory_space<vmem>>, vector<32x96xbf16>
    %cst = arith.constant dense<0.000000e+00> : vector<16x96xf32>
    %3 = tpu.matmul %1, %2, %cst {dimension_numbers = #tpu.dot_dimension_numbers<[1], [0], [0], [1], [0, 0, 1, 1], [], []>} : vector<16x32xbf16>, vector<32x96xbf16>, vector<16x96xf32> -> vector<16x96xf32>
    %c0_3 = arith.constant 0 : index
    %c0_4 = arith.constant 0 : index
    %4 = vector.load %arg4[%c0_3, %c0_4] : memref<1x96xf32, #tpu.memory_space<vmem>>, vector<1x96xf32>
    %5 = vector.broadcast %4 : vector<1x96xf32> to vector<16x96xf32>
    %6 = arith.addf %3, %5 : vector<16x96xf32>
    %7 = arith.truncf %6 : vector<16x96xf32> to vector<16x96xbf16>
    %c0_5 = arith.constant 0 : index
    %c0_6 = arith.constant 0 : index
    %8 = vector.load %arg5[%c0_5, %c0_6] : memref<16x96xbf16, #tpu.memory_space<vmem>>, vector<16x96xbf16>
    tpu.vector_store %arg5[%c0_5, %c0_6], %7 {strides = array<i32>} : memref<16x96xbf16, #tpu.memory_space<vmem>>, vector<16x96xbf16>,
    return
  }
  func.func @transform_0(%arg0: i32, %arg1: i32) -> (i32, i32) {
    %c0_i32 = arith.constant 0 : i32
    %c0_i32_0 = arith.constant 0 : i32
    return %arg0, %c0_i32 : i32, i32
  }
  func.func @transform_1(%arg0: i32, %arg1: i32) -> (i32, i32) {
    %c0_i32 = arith.constant 0 : i32
    %c0_i32_0 = arith.constant 0 : i32
    return %c0_i32, %arg1 : i32, i32
  }
  func.func @transform_2(%arg0: i32, %arg1: i32) -> (i32, i32) {
    %c0_i32 = arith.constant 0 : i32
    %c0_i32_0 = arith.constant 0 : i32
    return %c0_i32, %arg1 : i32, i32
  }
  func.func @transform_3(%arg0: i32, %arg1: i32) -> (i32, i32) {
    %c0_i32 = arith.constant 0 : i32
    return %arg0, %arg1 : i32, i32
  }
}

</mosaic_0001>

<bundles_post_ra>
// kernel: tpu_custom_call.1
= control target key start
LH: loop header
LB: loop body
LE: loop exit
PB: predicated region body
PF: predicated region fallthrough
CT: control target
= control target key end

     0   :  { %8 = vsyncpa [#allocation3], 0  ;;  %s320_s0 = inlined_call_operand.hbm [shape: f32[16,32], index: 0, kind: input, shape index: {}]   ;;  %s321_s1 = inlined_call_operand.hbm [shape: bf16[32,96], index: 1, kind: input, shape index: {}]   ;;  %s322_s2 = inlined_call_operand.vmem [shape: f32[1,96], index: 2, kind: input, shape index: {}]   ;;  %s323_s3 = inlined_call_operand.hbm [shape: bf16[16,96], index: 3, kind: output, shape index: {}]  }
   0x1   :  { %9 = vsyncpa [#allocation6], 0 }
   0x2   :  { %10 = vsyncpa [#allocation4], 0  ;;  %s246_s12 = smov [#allocation2]   ;;  %s174_s16 = scalar_lea.hbm %s320_s0, 256 }
   0x3   :  { %s16_s13 = sshll.u32 %s246_s12, 4  ;;  %p175_p0 = scmp.ne.s32.totalorder %s320_s0, %s174_s16  ;;  %s17_s13 = int_to_ptr.vmem [resolvable:$true] %s16_s13 }
   0x4   :  { %p178_p1 = scmp.lt.u32.totalorder %s174_s16, %s320_s0 }
   0x6   :  { %p180_p2 = pnand %p178_p1, %p175_p0 }
   0x8   :  { %183 = shalt.err (!%p180_p2)
}
   0x9   :  { %s184_s21 = scalar_lea.vmem %s17_s13, 256  ;;  %p189_p4 = scmp.lt.s32.totalorder %s17_s13, %s17_s13 }
   0xa   :  { %p185_p3 = scmp.ne.s32.totalorder %s17_s13, %s184_s21  ;;  %p190_p5 = scmp.lt.s32.totalorder %s184_s21, %s184_s21 }
   0xc   :  { %p191_p6 = por %p190_p5, %p189_p4 }
   0xe   :  { %p192_p7 = pnand %p191_p6, %p185_p3 }
  0x10   :  { %195 = shalt.err (!%p192_p7)
}
  0x11   :  { %s247_s22 = smov 128   ;;  %s248_s23 = smov 8  }
  0x12   :  { %22 = dma.hbm_to_vmem [thread:$0]  %s320_s0, 256, %s17_s13, [#allocation3], %s247_s22, %s247_s22, %s248_s23  }
  0x13   :  { %s249_s26 = smov [#allocation5]   ;;  %s196_s30 = scalar_lea.hbm %s321_s1, 256 }
  0x14   :  { %s28_s27 = sshll.u32 %s249_s26, 4  ;;  %p197_p8 = scmp.ne.s32.totalorder %s321_s1, %s196_s30  ;;  %s29_s27 = int_to_ptr.vmem [resolvable:$true] %s28_s27 }
  0x15   :  { %p200_p9 = scmp.lt.u32.totalorder %s196_s30, %s321_s1 }
  0x17   :  { %p202_p10 = pnand %p200_p9, %p197_p8 }
  0x19   :  { %205 = shalt.err (!%p202_p10)
}
  0x1a   :  { %s206_s8 = scalar_lea.vmem %s29_s27, 256  ;;  %p211_p12 = scmp.lt.s32.totalorder %s29_s27, %s29_s27 }
  0x1b   :  { %p207_p11 = scmp.ne.s32.totalorder %s29_s27, %s206_s8  ;;  %p212_p13 = scmp.lt.s32.totalorder %s206_s8, %s206_s8 }
  0x1d   :  { %p213_p0 = por %p212_p13, %p211_p12 }
  0x1f   :  { %p214_p1 = pnand %p213_p0, %p207_p11 }
  0x21   :  { %217 = shalt.err (!%p214_p1)
}
  0x22   :  { %s250_s0 = smov 64   ;;  %s251_s9 = smov 4  }
  0x23   :  { %34 = dma.hbm_to_vmem [thread:$0]  %s321_s1, 256, %s29_s27, [#allocation6], %s250_s0, %s250_s0, %s251_s9  }
  0x24   :  { %240 = dma.done.wait [#allocation3], 256  }
  0x25   :  { %241 = vsyncadd [#allocation3], 4294967040 }
  0x26   :  { %242 = dma.done.wait [#allocation6], 256  }
  0x27   :  { %243 = vsyncadd [#allocation6], 4294967040  ;;  %v252_v0 = vmov 0.0   ;;  %vm253_vm0 = vmmov 0   ;;  %v172_v1 = vld [vmem:[#allocation5] sm:$0xff]   ;;  %v173_v2 = vld [vmem:[#allocation5 + $0x8] sm:$0xff]  }
  0x28   :  { %155 = vmatprep.subr.bf16.mxu0 %v252_v0  ;;  %159 = vmatprep.mubr.msk.bf16.mxu0 %vm253_vm0, %v252_v0  ;;  %v44_v3 = vld [vmem:[#allocation2] sm:$0xff]  ;;  %v45_v4 = vld [vmem:[#allocation2 + $0x8] sm:$0xff]  ;;  %vm70_vm1 = vcmask 261120   ;;  %vm123_vm2 = vcmask 781312   ;;  %s254_s13 = smov [#allocation7]  }
  0x29   :  { %156 = vmatpush3.bf16.msra.mxu0 %v172_v1  ;;  %v46_v5 = vpack.c.bf16 %v45_v4, %v44_v3  ;;  %v144_v6 = vld [vmem:[%s322_s2] ss:$0 sm:$0xff]  ;;  %s131_s14 = sshll.u32 %s254_s13, 4  ;;  %s132_s14 = int_to_ptr.vmem [resolvable:$true] %s131_s14 }
  0x2a   :  { %157 = vmatprep.subr.bf16.mxu0 %v252_v0  ;;  %s218_s15 = scalar_lea.vmem %s132_s14, 128  ;;  %p223_p3 = scmp.lt.s32.totalorder %s132_s14, %s132_s14 }
  0x2b   :  { %p219_p2 = scmp.ne.s32.totalorder %s132_s14, %s218_s15  ;;  %p224_p4 = scmp.lt.s32.totalorder %s218_s15, %s218_s15 }
  0x2d   :  { %158 = vmatpush3.bf16.msra.mxu0 %v173_v2  ;;  %p225_p5 = por %p224_p4, %p223_p3 }
  0x2f   :  { %p226_p6 = pnand %p225_p5, %p219_p2 }
  0x30   :  { %160 = vmatmul.mubr.msk.bf16.vlgmr.msra.gmra.mrb[0].mxu0 %vm70_vm1, %v46_v5 }
 0x103   :  { %v108_v7 = vpop.f32.mrb[0].mxu0 }
 0x104   :  { %v109_v8 = vadd.f32 %v144_v6, %v108_v7  ;;  %v161_v9 = vpop.f32.mrb[1].mxu0 }
 0x105   :  { %v111_v10 = vpop.f32.mrb[2].mxu0 }
 0x106   :  { %v150_v11 = vpack.c.bf16 %v109_v8, %v109_v8  ;;  %v112_v12 = vadd.f32 %v144_v6, %v111_v10  ;;  %v162_v13 = vpop.f32.mrb[3].mxu0 }
 0x108   :  { %v151_v14 = vpack.c.bf16 %v112_v12, %v112_v12  ;;  %124 = vst.msk [vmem:[#allocation7] sm:$0xf] %vm123_vm2, %v150_v11 }
 0x10a   :  { %125 = vst.msk [vmem:[#allocation7 + $0x4] sm:$0xf] %vm123_vm2, %v151_v14 }
 0x10b   :  { %229 = shalt.err (!%p226_p6)
}
 0x10c   :  { %s230_s17 = scalar_lea.hbm %s323_s3, 128 }
 0x10d   :  { %p231_p7 = scmp.ne.s32.totalorder %s323_s3, %s230_s17  ;;  %p234_p8 = scmp.lt.u32.totalorder %s230_s17, %s323_s3 }
 0x10f   :  { %p236_p9 = pnand %p234_p8, %p231_p7 }
 0x111   :  { %239 = shalt.err (!%p236_p9)
}
 0x112   :  { %137 = dma.vmem_to_hbm [thread:$0]  %s132_s14, 128, %s323_s3, [#allocation4], %s250_s0, %s250_s0, %s251_s9  }
 0x113   :  { %244 = dma.done.wait [#allocation4], 128  }
 0x114   :  { %245 = vsyncadd [#allocation4], 4294967168 }
 0x115   :  { %141 = vsyncpa [#allocation3], 1 }
 0x116   :  { %142 = vsyncpa [#allocation6], 1 }
 0x117   :  { %143 = vsyncpa [#allocation4], 1 }

</bundles_post_ra>
